<compile_context>
chip_gen: v7x
topology: tpu7x:2x2x1
jax: 0.10.0
libtpu: 0.0.40
codegen_flags: <defaults>
</compile_context>

<pallas_src>
import jax
import jax.numpy as jnp
from jax.experimental import pallas as pl
from jax.experimental.pallas import tpu as pltpu

SIGMA = 0.3
EMBEDDING_SIZE = 10   # matches `embedding_size = 10` in the module
LANE_TILE = 512       # max batch tile (lane axis) per grid step


def duq_forward_kernel(x_ref, w1b_ref, w2_ref, wf3_ref, eb_ref, sel_ref,
                       zflat_ref, ypred_ref):
    # w1b packs [F, 4]: cols 0,1 = fc1 weight, col 2 = fc1 bias, col 3 = fc2 bias
    w1c0 = w1b_ref[:, 0:1]
    w1c1 = w1b_ref[:, 1:2]
    b1 = w1b_ref[:, 2:3]
    b2 = w1b_ref[:, 3:4]

    # ---- fc1 (K=2): two VPU broadcast FMAs, no MXU weight push ----
    x0 = x_ref[0:1, :]                                   # [1, TB]
    x1 = x_ref[1:2, :]                                   # [1, TB]
    h1 = jnp.maximum(w1c0 * x0 + w1c1 * x1 + b1, 0.0)    # [F, TB]

    # ---- fc2 on the MXU (f32 accumulation; weights may be bf16) ----
    wdt = w2_ref.dtype
    h2 = jnp.maximum(
        jnp.dot(w2_ref[...], h1.astype(wdt), preferred_element_type=jnp.float32)
        + b2, 0.0)                                       # [F, TB]

    # ---- fc3 folded into W: zflat = (Wf@W3) @ h2 + Wf@b3 ----
    zflat = (jnp.dot(wf3_ref[...], h2.astype(wdt),
                     preferred_element_type=jnp.float32)
             + eb_ref[:, 0:1])                           # [E*N, TB]
    zflat_ref[...] = zflat

    # ---- RBF head: sel folds -1/(E * 2 sigma^2); exp -> EUP ----
    diff2 = (zflat - eb_ref[:, 1:2]) ** 2                # [E*N, TB]
    ypred_ref[...] = jnp.exp(
        jnp.dot(sel_ref[...], diff2, preferred_element_type=jnp.float32))  # [Ncls, TB]


def duq_forward(x, params, *, weights_dtype=jnp.float32):
    """x: [B, 2] f32.  params in PyTorch layout (w: [out, in]).
    weights_dtype=jnp.bfloat16 is recommended on v6e/v7x (f32 accumulation kept)."""
    B = x.shape[0]
    W = params["W"]
    E, Ncls, F = W.shape
    EN = E * Ncls

    # ---- wrapper-side layout plumbing (not the hot path) ----
    B128 = ((B + 127) // 128) * 128
    TB = min(LANE_TILE, B128)                       # lane tile; multiple of 128
    B_pad = ((B + TB - 1) // TB) * TB
    x_t = jnp.zeros((2, B_pad), jnp.float32).at[:, :B].set(x.T)   # batch on lanes

    # fc1 weight + fc1/fc2 biases packed into one operand (used on VPU -> f32)
    w1b = jnp.concatenate(
        [params["w1"], params["b1"][:, None], params["b2"][:, None]],
        axis=1).astype(jnp.float32)                  # [F, 4]
    w2 = params["w2"].astype(weights_dtype)          # [F, F]

    # fold fc3 into the bilinear W (one matmul per tile instead of two)
    wf = W.reshape(EN, F).astype(jnp.float32)        # [E*N, F]
    wf3 = (wf @ params["w3"].astype(jnp.float32)).astype(weights_dtype)  # [E*N, F]
    bf3 = wf @ params["b3"].astype(jnp.float32)      # [E*N]
    emb = (params["m"] / params["N_buf"][None, :]).reshape(EN)           # [E*N]
    eb = jnp.stack([bf3, emb], axis=1).astype(jnp.float32)               # [E*N, 2]

    scale = -1.0 / (E * 2.0 * SIGMA * SIGMA)
    sel_scaled = (jnp.arange(EN)[None, :] % Ncls ==
                  jnp.arange(Ncls)[:, None]).astype(jnp.float32) * scale  # [Ncls, E*N]

    grid = (B_pad // TB,)
    zflat_t, ypred_t = pl.pallas_call(
        duq_forward_kernel,
        out_shape=(jax.ShapeDtypeStruct((EN, B_pad), jnp.float32),
                   jax.ShapeDtypeStruct((Ncls, B_pad), jnp.float32)),
        grid=grid,
        in_specs=[
            pl.BlockSpec((2, TB), lambda i: (0, i)),       # x: tiled over batch lanes
            pl.BlockSpec((F, 4), lambda i: (0, 0)),        # weights: VMEM-resident
            pl.BlockSpec((F, F), lambda i: (0, 0)),
            pl.BlockSpec((EN, F), lambda i: (0, 0)),
            pl.BlockSpec((EN, 2), lambda i: (0, 0)),
            pl.BlockSpec((Ncls, EN), lambda i: (0, 0)),
        ],
        out_specs=(
            pl.BlockSpec((EN, TB), lambda i: (0, i)),
            pl.BlockSpec((Ncls, TB), lambda i: (0, i)),
        ),
        compiler_params=pltpu.CompilerParams(
            dimension_semantics=("parallel",)),            # shard batch across TCs (v7x)
    )(x_t, w1b, w2, wf3, eb, sel_scaled)

    # undo the wrapper-side transpose / padding
    z = zflat_t[:, :B].T.reshape(B, E, Ncls)     # matches torch einsum 'ij,mnj->imn'
    y_pred = ypred_t[:, :B].T
    return z, y_pred


def init_params(key, features, num_embeddings):
    E = EMBEDDING_SIZE
    ks = jax.random.split(key, 8)

    def lin(kw, kb, fan_in, fan_out):
        bound = 1.0 / float(fan_in) ** 0.5
        w = jax.random.uniform(kw, (fan_out, fan_in), jnp.float32, -bound, bound)
        b = jax.random.uniform(kb, (fan_out,), jnp.float32, -bound, bound)
        return w, b

    w1, b1 = lin(ks[0], ks[1], 2, features)
    w2, b2 = lin(ks[2], ks[3], features, features)
    w3, b3 = lin(ks[4], ks[5], features, features)
    W = jax.random.normal(ks[6], (E, num_embeddings, features), jnp.float32)
    N_buf = jnp.ones((num_embeddings,), jnp.float32) * 20.0
    m = jax.random.normal(ks[7], (E, num_embeddings), jnp.float32) * N_buf[None, :]
    return dict(w1=w1, b1=b1, w2=w2, b2=b2, w3=w3, b3=b3, W=W, N_buf=N_buf, m=m)


def duq_forward_ref(x, params):
    """Pure-JAX reference mirroring the PyTorch forward."""
    h = jax.nn.relu(x @ params["w1"].T + params["b1"])
    h = jax.nn.relu(h @ params["w2"].T + params["b2"])
    h = h @ params["w3"].T + params["b3"]
    z = jnp.einsum("ij,mnj->imn", h, params["W"])
    emb = params["m"] / params["N_buf"][None, :]
    diff = z - emb[None]
    y_pred = jnp.exp(jnp.mean(-diff ** 2, axis=1) / (2.0 * SIGMA ** 2))
    return z, y_pred


if __name__ == "__main__":
    features = 32
    num_embeddings = 2   # two-moons: 2 classes

    key = jax.random.PRNGKey(0)
    kx, kp = jax.random.split(key)
    params = init_params(kp, features, num_embeddings)

    # batch=200 pads to 256 lanes (single fat tile); batch=8 pads to 128.
    for batch in (200, 8):
        x = jax.random.normal(jax.random.fold_in(kx, batch), (batch, 2), jnp.float32)
        z, y_pred = duq_forward(x, params)
        jax.block_until_ready((z, y_pred))

        z_ref, y_ref = duq_forward_ref(x, params)
        assert z.shape == (batch, EMBEDDING_SIZE, num_embeddings)
        assert y_pred.shape == (batch, num_embeddings)
        assert jnp.allclose(z, z_ref, atol=1e-4, rtol=1e-4)
        assert jnp.allclose(y_pred, y_ref, atol=1e-4, rtol=1e-4)

    print("KERNEL_OK")
</pallas_src>

<mosaic_0001>
module attributes {stable_mosaic.version = 11 : i64} {
  func.func @duq_forward_kernel(%arg0: i32, %arg1: memref<2x256xf32, #tpu.memory_space<vmem>>, %arg2: memref<32x4xf32, #tpu.memory_space<vmem>>, %arg3: memref<32x32xf32, #tpu.memory_space<vmem>>, %arg4: memref<20x32xf32, #tpu.memory_space<vmem>>, %arg5: memref<20x2xf32, #tpu.memory_space<vmem>>, %arg6: memref<2x20xf32, #tpu.memory_space<vmem>>, %arg7: memref<20x256xf32, #tpu.memory_space<vmem>>, %arg8: memref<2x256xf32, #tpu.memory_space<vmem>>) attributes {dimension_semantics = [#tpu.dimension_semantics<parallel>], iteration_bounds = array<i64: 1>, scalar_prefetch = 0 : i64, scratch_operands = 0 : i64, tpu.core_type = #tpu.core_type<tc>, window_params = [{transform_indices = @transform_0, window_bounds = array<i64: 2, 256>}, {pipeline_mode = #tpu.pipeline_mode<synchronous>, transform_indices = @transform_1, window_bounds = array<i64: 32, 4>}, {pipeline_mode = #tpu.pipeline_mode<synchronous>, transform_indices = @transform_2, window_bounds = array<i64: 32, 32>}, {pipeline_mode = #tpu.pipeline_mode<synchronous>, transform_indices = @transform_3, window_bounds = array<i64: 20, 32>}, {pipeline_mode = #tpu.pipeline_mode<synchronous>, transform_indices = @transform_4, window_bounds = array<i64: 20, 2>}, {pipeline_mode = #tpu.pipeline_mode<synchronous>, transform_indices = @transform_5, window_bounds = array<i64: 2, 20>}, {transform_indices = @transform_6, window_bounds = array<i64: 20, 256>}, {transform_indices = @transform_7, window_bounds = array<i64: 2, 256>}]} {
    %c0 = arith.constant 0 : index
    %c0_0 = arith.constant 0 : index
    %0 = vector.load %arg2[%c0, %c0_0] : memref<32x4xf32, #tpu.memory_space<vmem>>, vector<32x1xf32>
    %c0_1 = arith.constant 0 : index
    %c1 = arith.constant 1 : index
    %1 = vector.load %arg2[%c0_1, %c1] : memref<32x4xf32, #tpu.memory_space<vmem>>, vector<32x1xf32>
    %c0_2 = arith.constant 0 : index
    %c2 = arith.constant 2 : index
    %2 = vector.load %arg2[%c0_2, %c2] : memref<32x4xf32, #tpu.memory_space<vmem>>, vector<32x1xf32>
    %c0_3 = arith.constant 0 : index
    %c3 = arith.constant 3 : index
    %3 = vector.load %arg2[%c0_3, %c3] : memref<32x4xf32, #tpu.memory_space<vmem>>, vector<32x1xf32>
    %c0_4 = arith.constant 0 : index
    %c0_5 = arith.constant 0 : index
    %4 = vector.load %arg1[%c0_4, %c0_5] : memref<2x256xf32, #tpu.memory_space<vmem>>, vector<1x256xf32>
    %c1_6 = arith.constant 1 : index
    %c0_7 = arith.constant 0 : index
    %5 = vector.load %arg1[%c1_6, %c0_7] : memref<2x256xf32, #tpu.memory_space<vmem>>, vector<1x256xf32>
    %6 = vector.broadcast %0 : vector<32x1xf32> to vector<32x256xf32>
    %7 = vector.broadcast %4 : vector<1x256xf32> to vector<32x256xf32>
    %8 = arith.mulf %6, %7 : vector<32x256xf32>
    %9 = vector.broadcast %1 : vector<32x1xf32> to vector<32x256xf32>
    %10 = vector.broadcast %5 : vector<1x256xf32> to vector<32x256xf32>
    %11 = arith.mulf %9, %10 : vector<32x256xf32>
    %12 = arith.addf %8, %11 : vector<32x256xf32>
    %13 = vector.broadcast %2 : vector<32x1xf32> to vector<32x256xf32>
    %14 = arith.addf %12, %13 : vector<32x256xf32>
    %cst = arith.constant 0.000000e+00 : f32
    %15 = vector.broadcast %cst : f32 to vector<32x256xf32>
    %16 = arith.maximumf %14, %15 : vector<32x256xf32>
    %c0_8 = arith.constant 0 : index
    %c0_9 = arith.constant 0 : index
    %17 = vector.load %arg3[%c0_8, %c0_9] : memref<32x32xf32, #tpu.memory_space<vmem>>, vector<32x32xf32>
    %cst_10 = arith.constant dense<0.000000e+00> : vector<32x256xf32>
    %18 = tpu.matmul %17, %16, %cst_10 {dimension_numbers = #tpu.dot_dimension_numbers<[1], [0], [0], [1], [0, 0, 1, 1], [], []>} : vector<32x32xf32>, vector<32x256xf32>, vector<32x256xf32> -> vector<32x256xf32>
    %19 = vector.broadcast %3 : vector<32x1xf32> to vector<32x256xf32>
    %20 = arith.addf %18, %19 : vector<32x256xf32>
    %cst_11 = arith.constant 0.000000e+00 : f32
    %21 = vector.broadcast %cst_11 : f32 to vector<32x256xf32>
    %22 = arith.maximumf %20, %21 : vector<32x256xf32>
    %c0_12 = arith.constant 0 : index
    %c0_13 = arith.constant 0 : index
    %23 = vector.load %arg4[%c0_12, %c0_13] : memref<20x32xf32, #tpu.memory_space<vmem>>, vector<20x32xf32>
    %cst_14 = arith.constant dense<0.000000e+00> : vector<20x256xf32>
    %24 = tpu.matmul %23, %22, %cst_14 {dimension_numbers = #tpu.dot_dimension_numbers<[1], [0], [0], [1], [0, 0, 1, 1], [], []>} : vector<20x32xf32>, vector<32x256xf32>, vector<20x256xf32> -> vector<20x256xf32>
    %c0_15 = arith.constant 0 : index
    %c0_16 = arith.constant 0 : index
    %25 = vector.load %arg5[%c0_15, %c0_16] : memref<20x2xf32, #tpu.memory_space<vmem>>, vector<20x1xf32>
    %26 = vector.broadcast %25 : vector<20x1xf32> to vector<20x256xf32>
    %27 = arith.addf %24, %26 : vector<20x256xf32>
    %c0_17 = arith.constant 0 : index
    %c0_18 = arith.constant 0 : index
    %28 = vector.load %arg7[%c0_17, %c0_18] : memref<20x256xf32, #tpu.memory_space<vmem>>, vector<20x256xf32>
    tpu.vector_store %arg7[%c0_17, %c0_18], %27 {strides = array<i32>} : memref<20x256xf32, #tpu.memory_space<vmem>>, vector<20x256xf32>,
    %c0_19 = arith.constant 0 : index
    %c1_20 = arith.constant 1 : index
    %29 = vector.load %arg5[%c0_19, %c1_20] : memref<20x2xf32, #tpu.memory_space<vmem>>, vector<20x1xf32>
    %30 = vector.broadcast %29 : vector<20x1xf32> to vector<20x256xf32>
    %31 = arith.subf %27, %30 : vector<20x256xf32>
    %32 = arith.mulf %31, %31 : vector<20x256xf32>
    %c0_21 = arith.constant 0 : index
    %c0_22 = arith.constant 0 : index
    %33 = vector.load %arg6[%c0_21, %c0_22] : memref<2x20xf32, #tpu.memory_space<vmem>>, vector<2x20xf32>
    %cst_23 = arith.constant dense<0.000000e+00> : vector<2x256xf32>
    %34 = tpu.matmul %33, %32, %cst_23 {dimension_numbers = #tpu.dot_dimension_numbers<[1], [0], [0], [1], [0, 0, 1, 1], [], []>} : vector<2x20xf32>, vector<20x256xf32>, vector<2x256xf32> -> vector<2x256xf32>
    %35 = math.exp %34 : vector<2x256xf32>
    %c0_24 = arith.constant 0 : index
    %c0_25 = arith.constant 0 : index
    %36 = vector.load %arg8[%c0_24, %c0_25] : memref<2x256xf32, #tpu.memory_space<vmem>>, vector<2x256xf32>
    tpu.vector_store %arg8[%c0_24, %c0_25], %35 {strides = array<i32>} : memref<2x256xf32, #tpu.memory_space<vmem>>, vector<2x256xf32>,
    return
  }
  func.func @transform_0(%arg0: i32) -> (i32, i32) {
    %c0_i32 = arith.constant 0 : i32
    %c0_i32_0 = arith.constant 0 : i32
    return %c0_i32, %arg0 : i32, i32
  }
  func.func @transform_1(%arg0: i32) -> (i32, i32) {
    %c0_i32 = arith.constant 0 : i32
    %c0_i32_0 = arith.constant 0 : i32
    %c0_i32_1 = arith.constant 0 : i32
    return %c0_i32, %c0_i32_0 : i32, i32
  }
  func.func @transform_2(%arg0: i32) -> (i32, i32) {
    %c0_i32 = arith.constant 0 : i32
    %c0_i32_0 = arith.constant 0 : i32
    %c0_i32_1 = arith.constant 0 : i32
    return %c0_i32, %c0_i32_0 : i32, i32
  }
  func.func @transform_3(%arg0: i32) -> (i32, i32) {
    %c0_i32 = arith.constant 0 : i32
    %c0_i32_0 = arith.constant 0 : i32
    %c0_i32_1 = arith.constant 0 : i32
    return %c0_i32, %c0_i32_0 : i32, i32
  }
  func.func @transform_4(%arg0: i32) -> (i32, i32) {
    %c0_i32 = arith.constant 0 : i32
    %c0_i32_0 = arith.constant 0 : i32
    %c0_i32_1 = arith.constant 0 : i32
    return %c0_i32, %c0_i32_0 : i32, i32
  }
  func.func @transform_5(%arg0: i32) -> (i32, i32) {
    %c0_i32 = arith.constant 0 : i32
    %c0_i32_0 = arith.constant 0 : i32
    %c0_i32_1 = arith.constant 0 : i32
    return %c0_i32, %c0_i32_0 : i32, i32
  }
  func.func @transform_6(%arg0: i32) -> (i32, i32) {
    %c0_i32 = arith.constant 0 : i32
    %c0_i32_0 = arith.constant 0 : i32
    return %c0_i32, %arg0 : i32, i32
  }
  func.func @transform_7(%arg0: i32) -> (i32, i32) {
    %c0_i32 = arith.constant 0 : i32
    %c0_i32_0 = arith.constant 0 : i32
    return %c0_i32, %arg0 : i32, i32
  }
}

</mosaic_0001>

<bundles_post_ra>
// kernel: tpu_custom_call.1
= control target key start
LH: loop header
LB: loop body
LE: loop exit
PB: predicated region body
PF: predicated region fallthrough
CT: control target
= control target key end

     0   :  { %13 = vsyncpa [#allocation3], 0  ;;  %v662_v1 = vmov 1   ;;  %v663_v2 = vmov 0   ;;  %s809_s0 = inlined_call_operand.vmem [shape: f32[2,256], index: 0, kind: input, shape index: {}]   ;;  %s810_s1 = inlined_call_operand.vmem [shape: f32[32,4], index: 1, kind: input, shape index: {}]   ;;  %s811_s2 = inlined_call_operand.vmem [shape: f32[32,32], index: 2, kind: input, shape index: {}]   ;;  %s812_s3 = inlined_call_operand.vmem [shape: f32[20,32], index: 3, kind: input, shape index: {}]   ;;  %s813_s4 = inlined_call_operand.vmem [shape: f32[20,2], index: 4, kind: input, shape index: {}]   ;;  %s814_s5 = inlined_call_operand.vmem [shape: f32[2,20], index: 5, kind: input, shape index: {}]   ;;  %s815_s6 = inlined_call_operand.hbm [shape: f32[20,256], index: 6, kind: output, shape index: {0}]   ;;  %s816_s7 = inlined_call_operand.hbm [shape: f32[2,256], index: 7, kind: output, shape index: {1}]  }
   0x1   :  { %v27_v0 = vld [vmem:[%s810_s1] sm:$0xff]  ;;  %598 = vset.pattern.permute.xlu1 %v662_v1  ;;  %597 = vset.pattern.permute.xlu0 %v663_v2 }
   0x2   :  { %14 = vsyncpa [#allocation5], 0  ;;  %74 = vperm.xlu1 %598, %v27_v0   ;;  %36 = vperm.xlu0 %597, %v27_v0   ;;  %v28_v3 = vld [vmem:[%s810_s1 + $0x8] sm:$0xff]  ;;  %v29_v4 = vld [vmem:[%s810_s1 + $0x10] sm:$0xff]  ;;  %v664_v6 = vmov 2   ;;  %v665_v7 = vmov 0.0   ;;  %v55_v9 = vlaneseq }
   0x3   :  { %v30_v5 = vld [vmem:[%s810_s1 + $0x18] sm:$0xff]  ;;  %245 = vmatprep.mubr.f32.mxu0 %v665_v7  ;;  %372 = vmatprep.mubr.f32.mxu1 %v665_v7  ;;  %v666_v8 = vmov 3   ;;  %v556_v17 = vld [vmem:[%s809_s0 + $0x1] ss:$2 sm:$0x3]  ;;  %vm168_vm0 = vcmask 261120  }
   0x4   :  { %v56_v12 = vshrl.u32 %v55_v9, 7  ;;  %v31_v18 = vld [vmem:[%s809_s0] ss:$2 sm:$0x3]  ;;  %vm432_vm1 = vcmask 1043456   ;;  %vm428_vm2 = vcmask 162816  }
   0x5   :  { %s667_s1 = smov [#allocation2]  }
   0x6   :  { %78 = vperm.xlu1 %598, %v28_v3   ;;  %41 = vperm.xlu0 %597, %v28_v3   ;;  %v57_v15 = vsub.s32 0, %v56_v12  ;;  %v61_v16 = vsub.s32 1, %v56_v12  ;;  %s531_s9 = sshll.u32 %s667_s1, 4  ;;  %s532_s9 = int_to_ptr.vmem [resolvable:$true] %s531_s9 }
   0x7   :  { %s614_s10 = scalar_lea.vmem %s532_s9, 768  ;;  %p619_p1 = scmp.lt.s32.totalorder %s532_s9, %s532_s9 }
   0x8   :  { %v93_v21 = vrot.slane %v556_v17, %v57_v15  ;;  %v97_v22 = vrot.slane %v556_v17, %v61_v16  ;;  %v58_v23 = vrot.slane %v31_v18, %v57_v15  ;;  %v62_v24 = vrot.slane %v31_v18, %v61_v16  ;;  %v150_v15 = vld [vmem:[%s811_s2 + $0x10] sm:$0xff]  ;;  %v151_v16 = vld [vmem:[%s811_s2 + $0x18] sm:$0xff]  ;;  %v281_v17 = vld [vmem:[%s813_s4] sm:$0xff]  ;;  %p615_p0 = scmp.ne.s32.totalorder %s532_s9, %s614_s10  ;;  %p620_p2 = scmp.lt.s32.totalorder %s614_s10, %s614_s10 }
   0x9   :  { %v398_v18 = vld [vmem:[%s813_s4 + $0x8] sm:$0xff] }
   0xa   :  { %599 = vset.pattern.permute.xlu1 %v663_v2  ;;  %46 = vperm.xlu0 %597, %v29_v4   ;;  %p621_p3 = por %p620_p2, %p619_p1 }
   0xb   :  { %51 = vperm.xlu1 %599, %v30_v5  }
   0xc   :  { %p622_p4 = pnand %p621_p3, %p615_p0 }
   0xe   :  { %600 = vset.pattern.permute.xlu0 %v662_v1 }
   0xf   :  { %601 = vset.pattern.permute.xlu1 %v662_v1  ;;  %82 = vperm.xlu0 %600, %v29_v4  }
  0x10   :  { %86 = vperm.xlu1 %601, %v30_v5  }
  0x13   :  { %603 = vset.pattern.permute.xlu0 %v664_v6 }
  0x14   :  { %602 = vset.pattern.permute.xlu1 %v664_v6  ;;  %121 = vperm.xlu0 %603, %v28_v3  }
  0x15   :  { %117 = vperm.xlu1 %602, %v27_v0  }
  0x18   :  { %604 = vset.pattern.permute.xlu0 %v666_v8 }
  0x19   :  { %125 = vperm.xlu1 %602, %v29_v4   ;;  %153 = vperm.xlu0 %604, %v27_v0  }
  0x1d   :  { %129 = vperm.xlu1 %602, %v30_v5   ;;  %165 = vperm.xlu0 %604, %v30_v5  }
  0x21   :  { %605 = vset.pattern.permute.xlu1 %v666_v8  ;;  %607 = vset.pattern.permute.xlu0 %v663_v2 }
  0x22   :  { %157 = vperm.xlu1 %605, %v28_v3   ;;  %291 = vperm.xlu0 %607, %v398_v18  }
  0x26   :  { %161 = vperm.xlu1 %605, %v29_v4  }
  0x2a   :  { %606 = vset.pattern.permute.xlu1 %v663_v2 }
  0x2b   :  { %286 = vperm.xlu1 %606, %v281_v17  }
  0x2f   :  { %608 = vset.pattern.permute.xlu1 %v662_v1 }
  0x30   :  { %402 = vperm.xlu1 %608, %v281_v17  }
  0x34   :  { %407 = vperm.xlu1 %608, %v398_v18  }
  0x81   :  { %v75_v10 = vpop.permute.xlu1 %74  ;;  %v37_v11 = vpop.permute.xlu0 %36 }
  0x82   :  { %v100_v30 = vmul.f32 %v93_v21, %v75_v10  ;;  %v101_v31 = vmul.f32 %v97_v22, %v75_v10  ;;  %v65_v32 = vmul.f32 %v58_v23, %v37_v11  ;;  %v66_v33 = vmul.f32 %v62_v24, %v37_v11 }
  0x84   :  { %v108_v38 = vadd.f32 %v100_v30, %v65_v32  ;;  %v109_v39 = vadd.f32 %v101_v31, %v66_v33 }
  0x85   :  { %v79_v13 = vpop.permute.xlu1 %78  ;;  %v42_v14 = vpop.permute.xlu0 %41 }
  0x86   :  { %v102_v25 = vmul.f32 %v93_v21, %v79_v13  ;;  %v103_v26 = vmul.f32 %v97_v22, %v79_v13  ;;  %v67_v27 = vmul.f32 %v58_v23, %v42_v14  ;;  %v68_v28 = vmul.f32 %v62_v24, %v42_v14  ;;  %v148_v13 = vld [vmem:[%s811_s2] sm:$0xff]  ;;  %v149_v14 = vld [vmem:[%s811_s2 + $0x8] sm:$0xff] }
  0x88   :  { %v110_v35 = vadd.f32 %v102_v25, %v67_v27  ;;  %v111_v36 = vadd.f32 %v103_v26, %v68_v28 }
  0x89   :  { %v47_v19 = vpop.permute.xlu0 %46 }
  0x8a   :  { %v52_v20 = vpop.permute.xlu1 %51  ;;  %v69_v47 = vmul.f32 %v58_v23, %v47_v19  ;;  %v70_v48 = vmul.f32 %v62_v24, %v47_v19  ;;  %v283_v19 = vld [vmem:[%s813_s4 + $0x10] sm:$0xf] }
  0x8b   :  { %v71_v55 = vmul.f32 %v58_v23, %v52_v20  ;;  %v72_v56 = vmul.f32 %v62_v24, %v52_v20  ;;  %296 = vperm.xlu0 %607, %v283_v19   ;;  %v399_v20 = vld [vmem:[%s813_s4 + $0x10] sm:$0xf] }
  0x8c   :  { %412 = vperm.xlu1 %608, %v399_v20  }
  0x8e   :  { %v83_v29 = vpop.permute.xlu0 %82 }
  0x8f   :  { %v87_v34 = vpop.permute.xlu1 %86  ;;  %v104_v43 = vmul.f32 %v93_v21, %v83_v29  ;;  %v105_v44 = vmul.f32 %v97_v22, %v83_v29  ;;  %609 = vset.pattern.permute.xlu0 %v662_v1 }
  0x90   :  { %v106_v51 = vmul.f32 %v93_v21, %v87_v34  ;;  %v107_v52 = vmul.f32 %v97_v22, %v87_v34 }
  0x91   :  { %v112_v58 = vadd.f32 %v104_v43, %v69_v47  ;;  %v113_v59 = vadd.f32 %v105_v44, %v70_v48 }
  0x92   :  { %v114_v0 = vadd.f32 %v106_v51, %v71_v55  ;;  %v115_v2 = vadd.f32 %v107_v52, %v72_v56  ;;  %v278_v52 = vld [vmem:[%s812_s3] sm:$0xff] }
  0x93   :  { %v122_v37 = vpop.permute.xlu0 %121 }
  0x94   :  { %v134_v40 = vadd.f32 %v122_v37, %v110_v35  ;;  %v135_v41 = vadd.f32 %v122_v37, %v111_v36  ;;  %v118_v42 = vpop.permute.xlu1 %117 }
  0x95   :  { %v132_v45 = vadd.f32 %v118_v42, %v108_v38  ;;  %v133_v46 = vadd.f32 %v118_v42, %v109_v39 }
  0x96   :  { %v142_v49 = vmax.f32 %v134_v40, 0.0  ;;  %v143_v50 = vmax.f32 %v135_v41, 0.0 }
  0x97   :  { %v140_v53 = vmax.f32 %v132_v45, 0.0  ;;  %v141_v54 = vmax.f32 %v133_v46, 0.0 }
  0x98   :  { %v126_v57 = vpop.permute.xlu1 %125  ;;  %v154_v22 = vpop.permute.xlu0 %153 }
  0x99   :  { %v568_v60 = vpack.c.bf16 %v143_v50, %v141_v54  ;;  %v570_v61 = vpack.c.bf16 %v142_v49, %v140_v53  ;;  %v136_v62 = vadd.f32 %v126_v57, %v112_v58  ;;  %v137_v63 = vadd.f32 %v126_v57, %v113_v59  ;;  %v279_v53 = vld [vmem:[%s812_s3 + $0x8] sm:$0xff]  ;;  %v280_v54 = vld [vmem:[%s812_s3 + $0x10] sm:$0xf] }
  0x9b   :  { %569 = vmatprep.subr.bf16.mxu0 %v568_v60  ;;  %v144_v6 = vmax.f32 %v136_v62, 0.0  ;;  %v145_v8 = vmax.f32 %v137_v63, 0.0 }
  0x9c   :  { %v130_v3 = vpop.permute.xlu1 %129  ;;  %571 = vmatpush1.bf16.msra.mxu0 %v570_v61  ;;  %v166_v41 = vpop.permute.xlu0 %165 }
  0x9d   :  { %v138_v4 = vadd.f32 %v130_v3, %v114_v0  ;;  %v139_v5 = vadd.f32 %v130_v3, %v115_v2 }
  0x9f   :  { %v146_v9 = vmax.f32 %v138_v4, 0.0  ;;  %v147_v10 = vmax.f32 %v139_v5, 0.0 }
  0xa1   :  { %v572_v11 = vpack.c.bf16 %v147_v10, %v145_v8  ;;  %v574_v12 = vpack.c.bf16 %v146_v9, %v144_v6  ;;  %v158_v24 = vpop.permute.xlu1 %157  ;;  %v292_v61 = vpop.permute.xlu0 %291 }
  0xa3   :  { %573 = vmatprep.subr.bf16.mxu0 %v572_v11 }
  0xa4   :  { %575 = vmatpush1.bf16.msra.mxu0 %v574_v12 }
  0xa5   :  { %v162_v34 = vpop.permute.xlu1 %161 }
  0xa7   :  { %557 = vmatmul.mubr.msk.f32.vlgmr.msra.gmra.mrb[0].mxu0 %vm168_vm0, %v148_v13 }
  0xa8   :  { %251 = vmatprep.mubr.f32.mxu0 %v665_v7 }
  0xaa   :  { %v287_v55 = vpop.permute.xlu1 %286 }
  0xab   :  { %558 = vmatmul.mubr.msk.f32.gmra.mrb[2].mxu0 %vm168_vm0, %v149_v14 }
  0xac   :  { %257 = vmatprep.mubr.f32.mxu0 %v665_v7 }
  0xaf   :  { %559 = vmatmul.mubr.msk.f32.gmra.mrb[4].mxu0 %vm168_vm0, %v150_v15  ;;  %v403_v56 = vpop.permute.xlu1 %402 }
  0xb0   :  { %263 = vmatprep.mubr.f32.mxu0 %v665_v7 }
  0xb3   :  { %560 = vmatmul.mubr.msk.f32.gmra.mrb[6].mxu0 %vm168_vm0, %v151_v16  ;;  %v408_v63 = vpop.permute.xlu1 %407 }
 0x10a   :  { %v297_v8 = vpop.permute.xlu0 %296 }
 0x10b   :  { %v413_v17 = vpop.permute.xlu1 %412 }
 0x17a   :  { %v247_v21 = vpop.f32.mrb[0].mxu0 }
 0x17b   :  { %v249_v23 = vpop.f32.mrb[1].mxu0  ;;  %v248_v25 = vadd.f32 %v247_v21, %v154_v22 }
 0x17c   :  { %v250_v26 = vadd.f32 %v249_v23, %v154_v22 }
 0x17d   :  { %v270_v31 = vmax.f32 %v248_v25, 0.0 }
 0x17e   :  { %v253_v27 = vpop.f32.mrb[2].mxu0  ;;  %v271_v33 = vmax.f32 %v250_v26, 0.0 }
 0x17f   :  { %v254_v28 = vadd.f32 %v253_v27, %v158_v24  ;;  %v255_v29 = vpop.f32.mrb[3].mxu0 }
 0x180   :  { %v256_v30 = vadd.f32 %v255_v29, %v158_v24  ;;  %v427_v24 = vld [vmem:[%s814_s5] sm:$0x3] }
 0x181   :  { %v272_v32 = vmax.f32 %v254_v28, 0.0 }
 0x182   :  { %v273_v1 = vmax.f32 %v256_v30, 0.0  ;;  %v259_v35 = vpop.f32.mrb[4].mxu0 }
 0x183   :  { %v261_v36 = vpop.f32.mrb[5].mxu0  ;;  %v578_v37 = vpack.c.bf16 %v272_v32, %v270_v31  ;;  %v260_v39 = vadd.f32 %v259_v35, %v162_v34 }
 0x184   :  { %v576_v38 = vpack.c.bf16 %v273_v1, %v271_v33  ;;  %v262_v40 = vadd.f32 %v261_v36, %v162_v34 }
 0x185   :  { %v274_v46 = vmax.f32 %v260_v39, 0.0 }
 0x186   :  { %v265_v42 = vpop.f32.mrb[6].mxu0  ;;  %577 = vmatprep.subr.bf16.mxu1 %v576_v38  ;;  %v275_v48 = vmax.f32 %v262_v40, 0.0 }
 0x187   :  { %v266_v43 = vadd.f32 %v265_v42, %v166_v41  ;;  %v267_v44 = vpop.f32.mrb[7].mxu0  ;;  %579 = vmatpush1.bf16.msra.mxu1 %v578_v37 }
 0x188   :  { %v268_v45 = vadd.f32 %v267_v44, %v166_v41 }
 0x189   :  { %v276_v47 = vmax.f32 %v266_v43, 0.0 }
 0x18a   :  { %v277_v49 = vmax.f32 %v268_v45, 0.0 }
 0x18b   :  { %v582_v50 = vpack.c.bf16 %v276_v47, %v274_v46 }
 0x18c   :  { %v580_v51 = vpack.c.bf16 %v277_v49, %v275_v48 }
 0x18e   :  { %581 = vmatprep.subr.bf16.mxu1 %v580_v51 }
 0x18f   :  { %583 = vmatpush1.bf16.msra.mxu1 %v582_v50 }
 0x192   :  { %561 = vmatmul.mubr.msk.f32.vlgmr.msra.gmra.mrb[0].mxu1 %vm168_vm0, %v278_v52 }
 0x193   :  { %378 = vmatprep.mubr.f32.mxu1 %v665_v7 }
 0x196   :  { %562 = vmatmul.mubr.msk.f32.gmra.mrb[2].mxu1 %vm168_vm0, %v279_v53 }
 0x197   :  { %384 = vmatprep.mubr.f32.mxu1 %v665_v7 }
 0x19a   :  { %563 = vmatmul.mubr.msk.f32.gmra.mrb[4].mxu1 %vm168_vm0, %v280_v54 }
 0x19b   :  { %503 = vmatprep.mubr.f32.mxu1 %v665_v7 }
 0x265   :  { %v374_v57 = vpop.f32.mrb[0].mxu1 }
 0x266   :  { %v375_v58 = vadd.f32 %v374_v57, %v287_v55  ;;  %v376_v59 = vpop.f32.mrb[1].mxu1 }
 0x267   :  { %v377_v60 = vadd.f32 %v376_v59, %v287_v55 }
 0x268   :  { %391 = vst [vmem:[#allocation2] sm:$0xff] %v375_v58  ;;  %v415_v0 = vsub.f32 %v375_v58, %v403_v56 }
 0x269   :  { %392 = vst [vmem:[#allocation2 + $0x8] sm:$0xff] %v377_v60  ;;  %v380_v62 = vpop.f32.mrb[2].mxu1  ;;  %v416_v4 = vsub.f32 %v377_v60, %v403_v56 }
 0x26a   :  { %v381_v2 = vadd.f32 %v380_v62, %v292_v61  ;;  %v382_v3 = vpop.f32.mrb[3].mxu1  ;;  %v421_v10 = vmul.f32 %v415_v0, %v415_v0 }
 0x26b   :  { %v383_v5 = vadd.f32 %v382_v3, %v292_v61  ;;  %v422_v14 = vmul.f32 %v416_v4, %v416_v4 }
 0x26c   :  { %393 = vst [vmem:[#allocation2 + $0x10] sm:$0xff] %v381_v2  ;;  %v417_v6 = vsub.f32 %v381_v2, %v408_v63 }
 0x26d   :  { %394 = vst [vmem:[#allocation2 + $0x18] sm:$0xff] %v383_v5  ;;  %v418_v7 = vsub.f32 %v383_v5, %v408_v63  ;;  %v386_v9 = vpop.f32.mrb[4].mxu1 }
 0x26e   :  { %v423_v11 = vmul.f32 %v417_v6, %v417_v6  ;;  %v387_v12 = vadd.f32 %v386_v9, %v297_v8  ;;  %v388_v13 = vpop.f32.mrb[5].mxu1 }
 0x26f   :  { %v424_v15 = vmul.f32 %v418_v7, %v418_v7  ;;  %v389_v16 = vadd.f32 %v388_v13, %v297_v8 }
 0x270   :  { %v586_v18 = vpack.c.bf16 %v423_v11, %v421_v10  ;;  %395 = vst [vmem:[#allocation2 + $0x20] sm:$0xf] %v387_v12  ;;  %v419_v21 = vsub.f32 %v387_v12, %v413_v17 }
 0x271   :  { %396 = vst [vmem:[#allocation2 + $0x28] sm:$0xf] %v389_v16  ;;  %v420_v19 = vsub.f32 %v389_v16, %v413_v17  ;;  %v584_v20 = vpack.c.bf16 %v424_v15, %v422_v14 }
 0x272   :  { %v425_v23 = vmul.f32 %v419_v21, %v419_v21 }
 0x273   :  { %v426_v22 = vmul.f32 %v420_v19, %v420_v19  ;;  %585 = vmatprep.subr.bf16.mxu1 %v584_v20 }
 0x274   :  { %587 = vmatpush1.bf16.msra.mxu1 %v586_v18 }
 0x275   :  { %564 = vmatprep.subr.msk.mxu1 %vm432_vm1, %v426_v22 }
 0x278   :  { %565 = vmatpush1.msk.msra.mxu1 %vm432_vm1, %v425_v23 }
 0x279   :  { %566 = vmatmul.mubr.msk.f32.vlgmr.msra.gmra.mrb[6].mxu1 %vm428_vm2, %v427_v24 }
 0x27a   :  { %625 = shalt.err (!%p622_p4)
}
 0x27b   :  { %s626_s12 = scalar_lea.hbm %s815_s6, 768 }
 0x27c   :  { %p627_p5 = scmp.ne.s32.totalorder %s815_s6, %s626_s12  ;;  %p630_p6 = scmp.lt.u32.totalorder %s626_s12, %s815_s6 }
 0x27e   :  { %p632_p7 = pnand %p630_p6, %p627_p5 }
 0x280   :  { %635 = shalt.err (!%p632_p7)
}
 0x281   :  { %s668_s16 = smov 256   ;;  %s669_s17 = smov 16  }
 0x282   :  { %537 = dma.vmem_to_hbm [thread:$0]  %s532_s9, 768, %s815_s6, [#allocation3], %s668_s16, %s668_s16, %s669_s17  }
 0x283   :  { %s670_s20 = smov [#allocation4]  }
 0x284   :  { %s544_s21 = sshll.u32 %s670_s20, 4  ;;  %s545_s21 = int_to_ptr.vmem [resolvable:$true] %s544_s21 }
 0x285   :  { %s636_s22 = scalar_lea.vmem %s545_s21, 64  ;;  %p641_p9 = scmp.lt.s32.totalorder %s545_s21, %s545_s21 }
 0x286   :  { %p637_p8 = scmp.ne.s32.totalorder %s545_s21, %s636_s22  ;;  %p642_p10 = scmp.lt.s32.totalorder %s636_s22, %s636_s22 }
 0x288   :  { %p643_p11 = por %p642_p10, %p641_p9 }
 0x28a   :  { %p644_p12 = pnand %p643_p11, %p637_p8 }
 0x34c   :  { %v505_v25 = vpop.f32.mrb[6].mxu1 }
 0x34d   :  { %v510_v26 = vmul.f32 1.442695, %v505_v25  ;;  %v507_v27 = vpop.f32.mrb[7].mxu1 }
 0x34e   :  { %v512_v28 = vmul.f32 1.442695, %v507_v27 }
 0x34f   :  { %610 = vpow2.f32 %v510_v26 }
 0x350   :  { %612 = vpow2.f32 %v512_v28 }
 0x359   :  { %v611_v29 = vpop.eup %610 }
 0x35a   :  { %v613_v30 = vpop.eup %612 }
 0x35b   :  { %v516_v31 = vcombine.low %v611_v29, %v613_v30 }
 0x35d   :  { %567 = vst.sshfl [vmem:[#allocation4] sm:$0x33 pattern:$0x76325410] %v516_v31 }
 0x35e   :  { %647 = shalt.err (!%p644_p12)
}
 0x35f   :  { %s648_s24 = scalar_lea.hbm %s816_s7, 64 }
 0x360   :  { %p649_p13 = scmp.ne.s32.totalorder %s816_s7, %s648_s24  ;;  %p652_p0 = scmp.lt.u32.totalorder %s648_s24, %s816_s7 }
 0x362   :  { %p654_p1 = pnand %p652_p0, %p649_p13 }
 0x364   :  { %657 = shalt.err (!%p654_p1)
}
 0x365   :  { %547 = dma.vmem_to_hbm [thread:$0]  %s545_s21, 64, %s816_s7, [#allocation5]  }
 0x366   :  { %658 = dma.done.wait [#allocation3], 768  }
 0x367   :  { %659 = vsyncadd [#allocation3], 4294966528 }
 0x368   :  { %660 = dma.done.wait [#allocation5], 64  }
 0x369   :  { %661 = vsyncadd [#allocation5], 4294967232 }
 0x36a   :  { %554 = vsyncpa [#allocation3], 1 }
 0x36b   :  { %555 = vsyncpa [#allocation5], 1 }

</bundles_post_ra>
